<compile_context>
chip_gen: v6e
topology: v6e:2x2x1
jax: 0.10.0
libtpu: 0.0.40
codegen_flags: <defaults>
</compile_context>

<pallas_src>
import functools

import jax
import jax.numpy as jnp
from jax import lax
from jax.experimental import pallas as pl
from jax.experimental.pallas import tpu as pltpu


def _round_up(x: int, m: int) -> int:
    return ((x + m - 1) // m) * m


def actor_kernel(obs_ref, w1_ref, w2_ref, w3_ref, out_ref, *,
                 obs_dim: int, hidden: int, act_dim: int, n_pad: int):
    """One batch tile: 3 matmuls + ReLU + per-action argmax, all in VMEM."""
    x = obs_ref[...]                                             # [TB, obs_dim] f32

    # Layer 1 (bias packed as row `obs_dim` of the same operand -> fewer DMAs).
    h1 = jnp.dot(x, w1_ref[0:obs_dim, :], preferred_element_type=jnp.float32)
    h1 = jnp.maximum(h1 + w1_ref[obs_dim:obs_dim + 1, :], 0.0)

    # Layer 2.
    h2 = jnp.dot(h1, w2_ref[0:hidden, :], preferred_element_type=jnp.float32)
    h2 = jnp.maximum(h2 + w2_ref[hidden:hidden + 1, :], 0.0)

    # Layer 3: [TB, act_dim * n_pad]; padded choice lanes sit at ~-1e30.
    logits = jnp.dot(h2, w3_ref[0:hidden, :], preferred_element_type=jnp.float32)
    logits = logits + w3_ref[hidden:hidden + 1, :]

    tb = logits.shape[0]
    # Hoisted iotas reused by every action group / output lane.
    idx = lax.broadcasted_iota(jnp.int32, (tb, n_pad), 1)        # within-group index
    lane = lax.broadcasted_iota(jnp.int32, (tb, 128), 1)         # output lane index

    result = jnp.zeros((tb, 128), jnp.int32)
    # act_dim is tiny and static: unrolled loop over aligned 128-lane vreg views.
    for a in range(act_dim):
        sl = logits[:, a * n_pad:(a + 1) * n_pad]                # [TB, n_pad] aligned
        mx = jnp.max(sl, axis=-1, keepdims=True)                 # [TB, 1]
        cand = jnp.where(sl == mx, idx, jnp.int32(n_pad))
        amax = jnp.min(cand, axis=-1, keepdims=True)             # first max index
        result = jnp.where(lane == a, amax, result)              # full-vreg select

    out_ref[...] = result                                        # one dense 128-lane store


def actor_forward(obs, packed_params, act_dim: int, n_pad: int, *,
                  max_block_batch: int = 2048, num_steps=None):
    """obs: [B, obs_dim] float32 -> [B, act_dim] int32 (argmax indices)."""
    w1p, w2p, w3p = packed_params
    B, obs_dim = obs.shape
    hidden = w1p.shape[1]

    # Minimize grid steps (step overhead dominates): one big tile up to
    # max_block_batch rows, then as few steps as possible with minimal padding.
    if num_steps is None:
        num_steps = max(1, pl.cdiv(B, max_block_batch))
        # TODO(synk): on v7x (2 TensorCores) round num_steps up to an even count for
        # large B so ("parallel",) can shard the batch over both cores.
    tb = _round_up(pl.cdiv(B, num_steps), 8)      # f32 sublane multiple
    b_pad = tb * num_steps
    if b_pad != B:
        obs = jnp.pad(obs, ((0, b_pad - B), (0, 0)))

    kernel = functools.partial(actor_kernel, obs_dim=obs_dim, hidden=hidden,
                               act_dim=act_dim, n_pad=n_pad)
    const = lambda i: (0, 0)      # weights: same block every step -> DMA'd once

    out = pl.pallas_call(
        kernel,
        out_shape=jax.ShapeDtypeStruct((b_pad, 128), jnp.int32),
        grid=(num_steps,),
        in_specs=[
            pl.BlockSpec((tb, obs_dim), lambda i: (i, 0)),   # obs tiles (pipelined)
            pl.BlockSpec(w1p.shape, const),                  # [W1; b1] packed
            pl.BlockSpec(w2p.shape, const),                  # [W2; b2] packed
            pl.BlockSpec(w3p.shape, const),                  # [W3; b3] packed + choice pad
        ],
        out_specs=pl.BlockSpec((tb, 128), lambda i: (i, 0)), # lane-dense output block
        compiler_params=pltpu.CompilerParams(
            dimension_semantics=("parallel",)),              # v7x: batch over both TCs
    )(obs, w1p, w2p, w3p)
    return out[:B, :act_dim]


def init_actor_params(key, obs_dim, act_dim, hidden_size, max_replicas):
    """Deterministic synthetic init (PyTorch nn.Linear-style uniform bounds).
    Weights are stored transposed ([in, out]) so the kernel does plain x @ W."""
    n_out = act_dim * (max_replicas + 1)
    keys = jax.random.split(key, 6)

    def linear(kw, kb, fan_in, fan_out):
        bound = 1.0 / jnp.sqrt(fan_in)
        w_t = jax.random.uniform(kw, (fan_in, fan_out), jnp.float32, -bound, bound)
        b = jax.random.uniform(kb, (1, fan_out), jnp.float32, -bound, bound)
        return w_t, b

    w1t, b1 = linear(keys[0], keys[1], obs_dim, hidden_size)
    w2t, b2 = linear(keys[2], keys[3], hidden_size, hidden_size)
    w3t, b3 = linear(keys[4], keys[5], hidden_size, n_out)
    return (w1t, b1, w2t, b2, w3t, b3)


def pack_actor_params(params, act_dim, max_replicas):
    """Pack each layer as [W; b] (bias = extra row, rows padded to a multiple of 8)
    and pad the output layer's per-action choice group to n_pad=128 lanes so every
    argmax slice is a full, aligned vreg view.  Padded W3 columns are zero; padded
    b3 entries are -1e30 (never win argmax)."""
    w1t, b1, w2t, b2, w3t, b3 = params
    n_choices = max_replicas + 1
    n_pad = max(128, _round_up(n_choices, 128))
    hidden = w3t.shape[0]
    extra = n_pad - n_choices

    w3p = jnp.pad(w3t.reshape(hidden, act_dim, n_choices),
                  ((0, 0), (0, 0), (0, extra))).reshape(hidden, act_dim * n_pad)
    b3p = jnp.pad(b3.reshape(1, act_dim, n_choices),
                  ((0, 0), (0, 0), (0, extra)),
                  constant_values=-1e30).reshape(1, act_dim * n_pad)

    def pack(w, b):
        packed = jnp.concatenate([w, b], axis=0)        # [in + 1, out]
        rows = packed.shape[0]
        pad_rows = _round_up(rows, 8) - rows
        if pad_rows:
            packed = jnp.pad(packed, ((0, pad_rows), (0, 0)))
        return packed

    return (pack(w1t, b1), pack(w2t, b2), pack(w3p, b3p)), n_pad


def _check(obs, out, params, act_dim, max_replicas):
    """Pure-JAX reference check (argmax over the original, unpadded logits)."""
    w1t, b1, w2t, b2, w3t, b3 = params
    hp = lax.Precision.HIGHEST
    h1 = jnp.maximum(jnp.dot(obs, w1t, precision=hp) + b1, 0.0)
    h2 = jnp.maximum(jnp.dot(h1, w2t, precision=hp) + b2, 0.0)
    logits = (jnp.dot(h2, w3t, precision=hp) + b3).reshape(
        obs.shape[0], act_dim, max_replicas + 1)
    ref = jnp.argmax(logits, axis=-1).astype(jnp.int32)

    assert out.shape == ref.shape
    assert out.dtype == jnp.int32
    assert bool(jnp.all((out >= 0) & (out <= max_replicas)))
    if not bool(jnp.all(out == ref)):
        # Accept only numerical near-ties: the chosen logit must equal the max
        # up to f32 matmul rounding noise.
        chosen = jnp.take_along_axis(logits, out[..., None].astype(jnp.int32),
                                     axis=-1)[..., 0]
        assert bool(jnp.all(logits.max(-1) - chosen <= 1e-4))


if __name__ == "__main__":
    obs_dim = 32
    hidden_size = 32
    act_dim = 4
    max_replicas = 10

    key = jax.random.PRNGKey(0)
    k_obs, k_obs2, k_params = jax.random.split(key, 3)

    params = init_actor_params(k_params, obs_dim, act_dim, hidden_size, max_replicas)
    packed_params, n_pad = pack_actor_params(params, act_dim, max_replicas)

    # Small batch (module-typical): one 8-row tile, grid=1.
    obs_small = jax.random.normal(k_obs, (2, obs_dim), dtype=jnp.float32)
    out_small = jax.block_until_ready(
        actor_forward(obs_small, packed_params, act_dim, n_pad))
    _check(obs_small, out_small, params, act_dim, max_replicas)

    # Larger, non-multiple batch: one 304-row tile (minimal padding), grid=1.
    obs_big = jax.random.normal(k_obs2, (300, obs_dim), dtype=jnp.float32)
    out_big = jax.block_until_ready(
        actor_forward(obs_big, packed_params, act_dim, n_pad))
    _check(obs_big, out_big, params, act_dim, max_replicas)

    print("KERNEL_OK")
</pallas_src>

<mosaic_0001>
module attributes {stable_mosaic.version = 11 : i64} {
  func.func @actor_kernel(%arg0: i32, %arg1: memref<8x32xf32, #tpu.memory_space<vmem>>, %arg2: memref<40x32xf32, #tpu.memory_space<vmem>>, %arg3: memref<40x32xf32, #tpu.memory_space<vmem>>, %arg4: memref<40x512xf32, #tpu.memory_space<vmem>>, %arg5: memref<8x128xi32, #tpu.memory_space<vmem>>) attributes {dimension_semantics = [#tpu.dimension_semantics<parallel>], iteration_bounds = array<i64: 1>, scalar_prefetch = 0 : i64, scratch_operands = 0 : i64, tpu.core_type = #tpu.core_type<tc>, window_params = [{transform_indices = @transform_0, window_bounds = array<i64: 8, 32>}, {pipeline_mode = #tpu.pipeline_mode<synchronous>, transform_indices = @transform_1, window_bounds = array<i64: 40, 32>}, {pipeline_mode = #tpu.pipeline_mode<synchronous>, transform_indices = @transform_2, window_bounds = array<i64: 40, 32>}, {pipeline_mode = #tpu.pipeline_mode<synchronous>, transform_indices = @transform_3, window_bounds = array<i64: 40, 512>}, {transform_indices = @transform_4, window_bounds = array<i64: 8, 128>}]} {
    %c0 = arith.constant 0 : index
    %c0_0 = arith.constant 0 : index
    %0 = vector.load %arg1[%c0, %c0_0] : memref<8x32xf32, #tpu.memory_space<vmem>>, vector<8x32xf32>
    %c0_1 = arith.constant 0 : index
    %c0_2 = arith.constant 0 : index
    %1 = vector.load %arg2[%c0_1, %c0_2] : memref<40x32xf32, #tpu.memory_space<vmem>>, vector<32x32xf32>
    %cst = arith.constant dense<0.000000e+00> : vector<8x32xf32>
    %2 = tpu.matmul %0, %1, %cst {dimension_numbers = #tpu.dot_dimension_numbers<[1], [0], [0], [1], [0, 0, 1, 1], [], []>} : vector<8x32xf32>, vector<32x32xf32>, vector<8x32xf32> -> vector<8x32xf32>
    %c32 = arith.constant 32 : index
    %c0_3 = arith.constant 0 : index
    %3 = vector.load %arg2[%c32, %c0_3] : memref<40x32xf32, #tpu.memory_space<vmem>>, vector<1x32xf32>
    %4 = vector.broadcast %3 : vector<1x32xf32> to vector<8x32xf32>
    %5 = arith.addf %2, %4 : vector<8x32xf32>
    %cst_4 = arith.constant 0.000000e+00 : f32
    %6 = vector.broadcast %cst_4 : f32 to vector<8x32xf32>
    %7 = arith.maximumf %5, %6 : vector<8x32xf32>
    %c0_5 = arith.constant 0 : index
    %c0_6 = arith.constant 0 : index
    %8 = vector.load %arg3[%c0_5, %c0_6] : memref<40x32xf32, #tpu.memory_space<vmem>>, vector<32x32xf32>
    %cst_7 = arith.constant dense<0.000000e+00> : vector<8x32xf32>
    %9 = tpu.matmul %7, %8, %cst_7 {dimension_numbers = #tpu.dot_dimension_numbers<[1], [0], [0], [1], [0, 0, 1, 1], [], []>} : vector<8x32xf32>, vector<32x32xf32>, vector<8x32xf32> -> vector<8x32xf32>
    %c32_8 = arith.constant 32 : index
    %c0_9 = arith.constant 0 : index
    %10 = vector.load %arg3[%c32_8, %c0_9] : memref<40x32xf32, #tpu.memory_space<vmem>>, vector<1x32xf32>
    %11 = vector.broadcast %10 : vector<1x32xf32> to vector<8x32xf32>
    %12 = arith.addf %9, %11 : vector<8x32xf32>
    %cst_10 = arith.constant 0.000000e+00 : f32
    %13 = vector.broadcast %cst_10 : f32 to vector<8x32xf32>
    %14 = arith.maximumf %12, %13 : vector<8x32xf32>
    %c0_11 = arith.constant 0 : index
    %c0_12 = arith.constant 0 : index
    %15 = vector.load %arg4[%c0_11, %c0_12] : memref<40x512xf32, #tpu.memory_space<vmem>>, vector<32x512xf32>
    %cst_13 = arith.constant dense<0.000000e+00> : vector<8x512xf32>
    %16 = tpu.matmul %14, %15, %cst_13 {dimension_numbers = #tpu.dot_dimension_numbers<[1], [0], [0], [1], [0, 0, 1, 1], [], []>} : vector<8x32xf32>, vector<32x512xf32>, vector<8x512xf32> -> vector<8x512xf32>
    %c32_14 = arith.constant 32 : index
    %c0_15 = arith.constant 0 : index
    %17 = vector.load %arg4[%c32_14, %c0_15] : memref<40x512xf32, #tpu.memory_space<vmem>>, vector<1x512xf32>
    %18 = vector.broadcast %17 : vector<1x512xf32> to vector<8x512xf32>
    %19 = arith.addf %16, %18 : vector<8x512xf32>
    %20 = tpu.iota {dimensions = array<i32: 1>} : vector<8x128xi32>
    %21 = tpu.iota {dimensions = array<i32: 1>} : vector<8x128xi32>
    %c0_i32 = arith.constant 0 : i32
    %22 = vector.broadcast %c0_i32 : i32 to vector<8x128xi32>
    %23 = vector.extract_strided_slice %19 {offsets = [0, 0], sizes = [8, 128], strides = [1, 1]} : vector<8x512xf32> to vector<8x128xf32>
    %cst_16 = arith.constant dense<0xFF800000> : vector<8xf32>
    %24 = vector.multi_reduction <maximumf>, %23, %cst_16 [1] : vector<8x128xf32> to vector<8xf32>
    %25 = vector.shape_cast %24 : vector<8xf32> to vector<8x1xf32>
    %26 = vector.broadcast %25 : vector<8x1xf32> to vector<8x128xf32>
    %27 = arith.cmpf oeq, %23, %26 : vector<8x128xf32>
    %c128_i32 = arith.constant 128 : i32
    %28 = vector.broadcast %c128_i32 : i32 to vector<8x128xi32>
    %29 = arith.select %27, %20, %28 : vector<8x128xi1>, vector<8x128xi32>
    %cst_17 = arith.constant dense<2147483647> : vector<8xi32>
    %30 = vector.multi_reduction <minsi>, %29, %cst_17 [1] : vector<8x128xi32> to vector<8xi32>
    %31 = vector.shape_cast %30 : vector<8xi32> to vector<8x1xi32>
    %c0_i32_18 = arith.constant 0 : i32
    %32 = vector.broadcast %c0_i32_18 : i32 to vector<8x128xi32>
    %33 = arith.cmpi eq, %21, %32 : vector<8x128xi32>
    %34 = vector.shape_cast %31 : vector<8x1xi32> to vector<8x1xi32>
    %35 = vector.broadcast %34 : vector<8x1xi32> to vector<8x128xi32>
    %36 = arith.select %33, %35, %22 : vector<8x128xi1>, vector<8x128xi32>
    %37 = vector.extract_strided_slice %19 {offsets = [0, 128], sizes = [8, 128], strides = [1, 1]} : vector<8x512xf32> to vector<8x128xf32>
    %cst_19 = arith.constant dense<0xFF800000> : vector<8xf32>
    %38 = vector.multi_reduction <maximumf>, %37, %cst_19 [1] : vector<8x128xf32> to vector<8xf32>
    %39 = vector.shape_cast %38 : vector<8xf32> to vector<8x1xf32>
    %40 = vector.broadcast %39 : vector<8x1xf32> to vector<8x128xf32>
    %41 = arith.cmpf oeq, %37, %40 : vector<8x128xf32>
    %c128_i32_20 = arith.constant 128 : i32
    %42 = vector.broadcast %c128_i32_20 : i32 to vector<8x128xi32>
    %43 = arith.select %41, %20, %42 : vector<8x128xi1>, vector<8x128xi32>
    %cst_21 = arith.constant dense<2147483647> : vector<8xi32>
    %44 = vector.multi_reduction <minsi>, %43, %cst_21 [1] : vector<8x128xi32> to vector<8xi32>
    %45 = vector.shape_cast %44 : vector<8xi32> to vector<8x1xi32>
    %c1_i32 = arith.constant 1 : i32
    %46 = vector.broadcast %c1_i32 : i32 to vector<8x128xi32>
    %47 = arith.cmpi eq, %21, %46 : vector<8x128xi32>
    %48 = vector.shape_cast %45 : vector<8x1xi32> to vector<8x1xi32>
    %49 = vector.broadcast %48 : vector<8x1xi32> to vector<8x128xi32>
    %50 = arith.select %47, %49, %36 : vector<8x128xi1>, vector<8x128xi32>
    %51 = vector.extract_strided_slice %19 {offsets = [0, 256], sizes = [8, 128], strides = [1, 1]} : vector<8x512xf32> to vector<8x128xf32>
    %cst_22 = arith.constant dense<0xFF800000> : vector<8xf32>
    %52 = vector.multi_reduction <maximumf>, %51, %cst_22 [1] : vector<8x128xf32> to vector<8xf32>
    %53 = vector.shape_cast %52 : vector<8xf32> to vector<8x1xf32>
    %54 = vector.broadcast %53 : vector<8x1xf32> to vector<8x128xf32>
    %55 = arith.cmpf oeq, %51, %54 : vector<8x128xf32>
    %c128_i32_23 = arith.constant 128 : i32
    %56 = vector.broadcast %c128_i32_23 : i32 to vector<8x128xi32>
    %57 = arith.select %55, %20, %56 : vector<8x128xi1>, vector<8x128xi32>
    %cst_24 = arith.constant dense<2147483647> : vector<8xi32>
    %58 = vector.multi_reduction <minsi>, %57, %cst_24 [1] : vector<8x128xi32> to vector<8xi32>
    %59 = vector.shape_cast %58 : vector<8xi32> to vector<8x1xi32>
    %c2_i32 = arith.constant 2 : i32
    %60 = vector.broadcast %c2_i32 : i32 to vector<8x128xi32>
    %61 = arith.cmpi eq, %21, %60 : vector<8x128xi32>
    %62 = vector.shape_cast %59 : vector<8x1xi32> to vector<8x1xi32>
    %63 = vector.broadcast %62 : vector<8x1xi32> to vector<8x128xi32>
    %64 = arith.select %61, %63, %50 : vector<8x128xi1>, vector<8x128xi32>
    %65 = vector.extract_strided_slice %19 {offsets = [0, 384], sizes = [8, 128], strides = [1, 1]} : vector<8x512xf32> to vector<8x128xf32>
    %cst_25 = arith.constant dense<0xFF800000> : vector<8xf32>
    %66 = vector.multi_reduction <maximumf>, %65, %cst_25 [1] : vector<8x128xf32> to vector<8xf32>
    %67 = vector.shape_cast %66 : vector<8xf32> to vector<8x1xf32>
    %68 = vector.broadcast %67 : vector<8x1xf32> to vector<8x128xf32>
    %69 = arith.cmpf oeq, %65, %68 : vector<8x128xf32>
    %c128_i32_26 = arith.constant 128 : i32
    %70 = vector.broadcast %c128_i32_26 : i32 to vector<8x128xi32>
    %71 = arith.select %69, %20, %70 : vector<8x128xi1>, vector<8x128xi32>
    %cst_27 = arith.constant dense<2147483647> : vector<8xi32>
    %72 = vector.multi_reduction <minsi>, %71, %cst_27 [1] : vector<8x128xi32> to vector<8xi32>
    %73 = vector.shape_cast %72 : vector<8xi32> to vector<8x1xi32>
    %c3_i32 = arith.constant 3 : i32
    %74 = vector.broadcast %c3_i32 : i32 to vector<8x128xi32>
    %75 = arith.cmpi eq, %21, %74 : vector<8x128xi32>
    %76 = vector.shape_cast %73 : vector<8x1xi32> to vector<8x1xi32>
    %77 = vector.broadcast %76 : vector<8x1xi32> to vector<8x128xi32>
    %78 = arith.select %75, %77, %64 : vector<8x128xi1>, vector<8x128xi32>
    %c0_28 = arith.constant 0 : index
    %c0_29 = arith.constant 0 : index
    %79 = vector.load %arg5[%c0_28, %c0_29] : memref<8x128xi32, #tpu.memory_space<vmem>>, vector<8x128xi32>
    tpu.vector_store %arg5[%c0_28, %c0_29], %78 {strides = array<i32>} : memref<8x128xi32, #tpu.memory_space<vmem>>, vector<8x128xi32>,
    return
  }
  func.func @transform_0(%arg0: i32) -> (i32, i32) {
    %c0_i32 = arith.constant 0 : i32
    %c0_i32_0 = arith.constant 0 : i32
    return %arg0, %c0_i32 : i32, i32
  }
  func.func @transform_1(%arg0: i32) -> (i32, i32) {
    %c0_i32 = arith.constant 0 : i32
    %c0_i32_0 = arith.constant 0 : i32
    %c0_i32_1 = arith.constant 0 : i32
    return %c0_i32, %c0_i32_0 : i32, i32
  }
  func.func @transform_2(%arg0: i32) -> (i32, i32) {
    %c0_i32 = arith.constant 0 : i32
    %c0_i32_0 = arith.constant 0 : i32
    %c0_i32_1 = arith.constant 0 : i32
    return %c0_i32, %c0_i32_0 : i32, i32
  }
  func.func @transform_3(%arg0: i32) -> (i32, i32) {
    %c0_i32 = arith.constant 0 : i32
    %c0_i32_0 = arith.constant 0 : i32
    %c0_i32_1 = arith.constant 0 : i32
    return %c0_i32, %c0_i32_0 : i32, i32
  }
  func.func @transform_4(%arg0: i32) -> (i32, i32) {
    %c0_i32 = arith.constant 0 : i32
    %c0_i32_0 = arith.constant 0 : i32
    return %arg0, %c0_i32 : i32, i32
  }
}

</mosaic_0001>

<bundles_post_ra>
// kernel: tpu_custom_call.1
= control target key start
LH: loop header
LB: loop body
LE: loop exit
PB: predicated region body
PF: predicated region fallthrough
CT: control target
= control target key end

     0   :  { %9 = vsyncpa [#allocation3], 0  ;;  %s654_s0 = inlined_call_operand.vmem [shape: f32[8,32], index: 0, kind: input, shape index: {}]   ;;  %s655_s1 = inlined_call_operand.vmem [shape: f32[40,32], index: 1, kind: input, shape index: {}]   ;;  %s656_s2 = inlined_call_operand.vmem [shape: f32[40,32], index: 2, kind: input, shape index: {}]   ;;  %s657_s3 = inlined_call_operand.hbm [shape: f32[40,512], index: 3, kind: input, shape index: {}]   ;;  %s658_s4 = inlined_call_operand.hbm [shape: s32[8,128], index: 4, kind: output, shape index: {}]  }
   0x1   :  { %10 = vsyncpa [#allocation4], 0  ;;  %s570_s15 = smov [#allocation2]  }
   0x2   :  { %s22_s16 = sshll.u32 %s570_s15, 4  ;;  %s23_s16 = int_to_ptr.vmem [resolvable:$true] %s22_s16 }
   0x3   :  { %s534_s17 = scalar_lea.vmem %s23_s16, 2560  ;;  %p539_p1 = scmp.lt.s32.totalorder %s23_s16, %s23_s16 }
   0x4   :  { %p535_p0 = scmp.ne.s32.totalorder %s23_s16, %s534_s17  ;;  %p540_p2 = scmp.lt.s32.totalorder %s534_s17, %s534_s17 }
   0x6   :  { %p541_p3 = por %p540_p2, %p539_p1 }
   0x8   :  { %p542_p4 = pnand %p541_p3, %p535_p0 }
   0xa   :  { %545 = shalt.err (!%p542_p4)
}
   0xb   :  { %s571_s18 = smov 512   ;;  %s572_s19 = smov 32  }
   0xc   :  { %28 = dma.hbm_to_vmem [thread:$0]  %s657_s3, 2560, %s23_s16, [#allocation3], %s571_s18, %s571_s18, %s572_s19  }
   0xd   :  { %566 = dma.done.wait [#allocation3], 2560  }
   0xe   :  { %567 = vsyncadd [#allocation3], 4294964736  ;;  %v573_v0 = vmov 0.0   ;;  %vm574_vm0 = vmmov 0   ;;  %v36_v1 = vld [vmem:[%s655_s1 + $0x18] sm:$0xff]  ;;  %v35_v2 = vld [vmem:[%s655_s1 + $0x10] sm:$0xff]  ;;  %v219_v36 = vlaneseq }
   0xf   :  { %498 = vmatprep.subr.mxu0 %v573_v0  ;;  %506 = vmatprep.mubr.msk.f32.mxu0 %vm574_vm0, %v573_v0  ;;  %v120_v3 = vld [vmem:[%s656_s2 + $0x18] sm:$0xff]  ;;  %v34_v4 = vld [vmem:[%s655_s1 + $0x8] sm:$0xff]  ;;  %v33_v5 = vld [vmem:[%s655_s1] sm:$0xff]  ;;  %vm42_vm1 = vcmask 261120  }
  0x10   :  { %509 = vmatprep.subr.mxu1 %v573_v0  ;;  %517 = vmatprep.mubr.msk.f32.mxu1 %vm574_vm0, %v573_v0  ;;  %v32_v6 = vld [vmem:[%s654_s0] sm:$0xff]  ;;  %v119_v7 = vld [vmem:[%s656_s2 + $0x10] sm:$0xff]  ;;  %v118_v8 = vld [vmem:[%s656_s2 + $0x8] sm:$0xff]  ;;  %v220_v37 = vshrl.u32 %v219_v36, 7  ;;  %v641_v55 = vand.u32 127, %v219_v36 }
  0x11   :  { %499 = vmatpush3.msra.mxu0 %v36_v1  ;;  %510 = vmatpush3.msra.mxu1 %v120_v3  ;;  %v117_v9 = vld [vmem:[%s656_s2] sm:$0xff]  ;;  %v213_v10 = vld [vmem:[#allocation2 + $0x68] sm:$0xff]  ;;  %v215_v11 = vld [vmem:[#allocation2 + $0x78] sm:$0xff] }
  0x12   :  { %500 = vmatprep.subr.mxu0 %v573_v0  ;;  %511 = vmatprep.subr.mxu1 %v573_v0  ;;  %v212_v12 = vld [vmem:[#allocation2 + $0x60] sm:$0xff]  ;;  %v209_v13 = vld [vmem:[#allocation2 + $0x48] sm:$0xff]  ;;  %v214_v19 = vld [vmem:[#allocation2 + $0x70] sm:$0xff]  ;;  %v221_v38 = vsub.s32 0, %v220_v37  ;;  %v229_v39 = vsub.s32 2, %v220_v37  ;;  %v225_v43 = vsub.s32 1, %v220_v37 }
  0x13   :  { %501 = vmatpush3.msra.mxu0 %v35_v2  ;;  %512 = vmatpush3.msra.mxu1 %v119_v7  ;;  %v482_v14 = vld [vmem:[%s655_s1 + $0x20] ss:$0 sm:$0xff]  ;;  %v211_v20 = vld [vmem:[#allocation2 + $0x58] sm:$0xff]  ;;  %v210_v22 = vld [vmem:[#allocation2 + $0x50] sm:$0xff]  ;;  %v233_v44 = vsub.s32 3, %v220_v37  ;;  %vm404_vm10 = vcmp.eq.s32.totalorder %v641_v55, 0 }
  0x14   :  { %502 = vmatprep.subr.mxu0 %v573_v0  ;;  %513 = vmatprep.subr.mxu1 %v573_v0  ;;  %v208_v21 = vld [vmem:[#allocation2 + $0x40] sm:$0xff]  ;;  %v205_v23 = vld [vmem:[#allocation2 + $0x28] sm:$0xff]  ;;  %v207_v24 = vld [vmem:[#allocation2 + $0x38] sm:$0xff]  ;;  %vm424_vm11 = vcmp.eq.s32.totalorder %v641_v55, 1  ;;  %vm444_vm12 = vcmp.eq.s32.totalorder %v641_v55, 2  ;;  %vm464_vm13 = vcmp.eq.s32.totalorder %v641_v55, 3 }
  0x15   :  { %503 = vmatpush3.msra.mxu0 %v34_v4  ;;  %514 = vmatpush3.msra.mxu1 %v118_v8  ;;  %v204_v25 = vld [vmem:[#allocation2 + $0x20] sm:$0xff]  ;;  %v206_v26 = vld [vmem:[#allocation2 + $0x30] sm:$0xff]  ;;  %v201_v27 = vld [vmem:[#allocation2 + $0x8] sm:$0xff] }
  0x16   :  { %504 = vmatprep.subr.mxu0 %v573_v0  ;;  %515 = vmatprep.subr.mxu1 %v573_v0  ;;  %v203_v28 = vld [vmem:[#allocation2 + $0x18] sm:$0xff]  ;;  %v200_v29 = vld [vmem:[#allocation2] sm:$0xff]  ;;  %v202_v30 = vld [vmem:[#allocation2 + $0x10] sm:$0xff] }
  0x17   :  { %505 = vmatpush3.msra.mxu0 %v33_v5  ;;  %516 = vmatpush3.msra.mxu1 %v117_v9  ;;  %v484_v31 = vld [vmem:[%s656_s2 + $0x20] ss:$0 sm:$0xff]  ;;  %s575_s2 = smov [#allocation5]  }
  0x18   :  { %507 = vmatmul.mubr.msk.f32.vlgmr.msra.gmra.mxu0 %vm42_vm1, %v32_v6  ;;  %266 = vmatprep.subr.mxu0 %v213_v10  ;;  %v217_v40 = vld [vmem:[#allocation2 + $0x80] ss:$8 sm:$0xf]  ;;  %s473_s15 = sshll.u32 %s575_s2, 4  ;;  %s474_s15 = int_to_ptr.vmem [resolvable:$true] %s473_s15 }
  0x19   :  { %306 = vmatprep.mubr.f32.mxu0 %v573_v0  ;;  %337 = vmatprep.subr.mxu1 %v215_v11  ;;  %v222_v41 = vrot.slane %v217_v40, %v221_v38  ;;  %v230_v42 = vrot.slane %v217_v40, %v229_v39  ;;  %v226_v49 = vrot.slane %v217_v40, %v225_v43  ;;  %s546_s16 = scalar_lea.vmem %s474_s15, 128  ;;  %p551_p6 = scmp.lt.s32.totalorder %s474_s15, %s474_s15 }
  0x1a   :  { %267 = vmatpush1.msra.mxu0 %v212_v12  ;;  %v234_v50 = vrot.slane %v217_v40, %v233_v44  ;;  %p547_p5 = scmp.ne.s32.totalorder %s474_s15, %s546_s16  ;;  %p552_p7 = scmp.lt.s32.totalorder %s546_s16, %s546_s16 }
  0x1b   :  { %268 = vmatprep.subr.mxu0 %v209_v13 }
  0x1c   :  { %269 = vmatpush1.msra.mxu0 %v208_v21  ;;  %p553_p8 = por %p552_p7, %p551_p6 }
  0x1d   :  { %270 = vmatprep.subr.mxu0 %v205_v23 }
  0x1e   :  { %271 = vmatpush1.msra.mxu0 %v204_v25  ;;  %p554_p9 = pnand %p553_p8, %p547_p5 }
  0x1f   :  { %272 = vmatprep.subr.mxu0 %v201_v27 }
  0x20   :  { %273 = vmatpush1.msra.mxu0 %v200_v29 }
  0xd8   :  { %v112_v15 = vpop.f32.mrf.mxu0 }
  0xd9   :  { %v113_v16 = vadd.f32 %v482_v14, %v112_v15 }
  0xda   :  { %v508_v17 = vpop.f32.mrf.mxu0 }
  0xdb   :  { %v116_v18 = vmax.f32 %v113_v16, 0.0 }
  0xdd   :  { %518 = vmatmul.mubr.msk.f32.vlgmr.msra.gmra.mxu1 %vm42_vm1, %v116_v18 }
  0xde   :  { %338 = vmatpush1.msra.mxu1 %v214_v19  ;;  %377 = vmatprep.mubr.f32.mxu1 %v573_v0 }
  0xdf   :  { %339 = vmatprep.subr.mxu1 %v211_v20 }
  0xe0   :  { %340 = vmatpush1.msra.mxu1 %v210_v22 }
  0xe1   :  { %341 = vmatprep.subr.mxu1 %v207_v24 }
  0xe2   :  { %342 = vmatpush1.msra.mxu1 %v206_v26 }
  0xe3   :  { %343 = vmatprep.subr.mxu1 %v203_v28 }
  0xe4   :  { %344 = vmatpush1.msra.mxu1 %v202_v30 }
 0x19d   :  { %v195_v32 = vpop.f32.mrf.mxu1 }
 0x19e   :  { %v196_v33 = vadd.f32 %v484_v31, %v195_v32 }
 0x19f   :  { %v519_v34 = vpop.f32.mrf.mxu1 }
 0x1a0   :  { %v199_v35 = vmax.f32 %v196_v33, 0.0 }
 0x1a2   :  { %486 = vmatmul.mubr.msk.f32.vlgmr.msra.gmra.mxu0 %vm42_vm1, %v199_v35  ;;  %487 = vmatmul.mubr.msk.f32.vlgmr.msra.gmra.mxu1 %vm42_vm1, %v199_v35 }
 0x262   :  { %v308_v45 = vpop.f32.mrf.mxu0  ;;  %v379_v46 = vpop.f32.mrf.mxu1 }
 0x263   :  { %v309_v47 = vadd.f32 %v308_v45, %v222_v41  ;;  %v380_v48 = vadd.f32 %v379_v46, %v230_v42 }
 0x264   :  { %v310_v51 = vpop.f32.mrf.mxu0  ;;  %v381_v52 = vpop.f32.mrf.mxu1 }
 0x265   :  { %426 = vmax.xlane.f32.xlu1 %v380_v48  ;;  %386 = vmax.xlane.f32.xlu0 %v309_v47  ;;  %v311_v53 = vadd.f32 %v310_v51, %v226_v49  ;;  %v382_v54 = vadd.f32 %v381_v52, %v234_v50 }
 0x269   :  { %446 = vmax.xlane.f32.xlu1 %v382_v54  ;;  %406 = vmax.xlane.f32.xlu0 %v311_v53 }
 0x2ee   :  { %v427_v56 = vpop.xlane.xlu1 %426  ;;  %v387_v57 = vpop.xlane.xlu0 %386 }
 0x2ef   :  { %vm428_vm2 = vcmp.eq.f32.partialorder %v380_v48, %v427_v56  ;;  %vm388_vm3 = vcmp.eq.f32.partialorder %v309_v47, %v387_v57 }
 0x2f0   :  { %v429_v58 = vsel %vm428_vm2, %v641_v55, 128  ;;  %v389_v59 = vsel %vm388_vm3, %v641_v55, 128 }
 0x2f1   :  { %v391_v60 = vshra.s32 %v389_v59, 16  ;;  %v431_v0 = vshra.s32 %v429_v58, 16  ;;  %v390_v8 = vand.u32 65535, %v389_v59  ;;  %v430_v9 = vand.u32 65535, %v429_v58 }
 0x2f2   :  { %v447_v61 = vpop.xlane.xlu1 %446  ;;  %v407_v62 = vpop.xlane.xlu0 %406 }
 0x2f3   :  { %vm448_vm4 = vcmp.eq.f32.partialorder %v382_v54, %v447_v61  ;;  %vm408_vm5 = vcmp.eq.f32.partialorder %v311_v53, %v407_v62  ;;  %v393_v63 = vcvt.s32.f32 %v391_v60  ;;  %v433_v4 = vcvt.s32.f32 %v431_v0 }
 0x2f4   :  { %v449_v1 = vsel %vm448_vm4, %v641_v55, 128  ;;  %v409_v2 = vsel %vm408_vm5, %v641_v55, 128  ;;  %v392_v12 = vcvt.s32.f32 %v390_v8  ;;  %v432_v18 = vcvt.s32.f32 %v430_v9 }
 0x2f5   :  { %394 = vmin.xlane.f32.xlu0 %v393_v63  ;;  %v411_v3 = vshra.s32 %v409_v2, 16  ;;  %v451_v6 = vshra.s32 %v449_v1, 16  ;;  %v410_v10 = vand.u32 65535, %v409_v2  ;;  %v450_v14 = vand.u32 65535, %v449_v1 }
 0x2f7   :  { %v413_v5 = vcvt.s32.f32 %v411_v3  ;;  %v453_v7 = vcvt.s32.f32 %v451_v6  ;;  %v412_v17 = vcvt.s32.f32 %v410_v10  ;;  %v452_v22 = vcvt.s32.f32 %v450_v14 }
 0x2f9   :  { %434 = vmin.xlane.f32.xlu0 %v433_v4  ;;  %414 = vmin.xlane.f32.xlu1 %v413_v5 }
 0x2fd   :  { %454 = vmin.xlane.f32.xlu1 %v453_v7 }
 0x37e   :  { %v395_v11 = vpop.xlane.xlu0 %394 }
 0x37f   :  { %vm396_vm6 = vcmp.eq.f32.partialorder %v393_v63, %v395_v11  ;;  %v401_v24 = vcvt.f32.s32 %v395_v11 }
 0x380   :  { %v397_v13 = vsel %vm396_vm6, %v392_v12, inf }
 0x381   :  { %398 = vmin.xlane.f32.xlu0 %v397_v13  ;;  %v402_v28 = vshll.u32 %v401_v24, 16 }
 0x382   :  { %v415_v15 = vpop.xlane.xlu1 %414  ;;  %v435_v16 = vpop.xlane.xlu0 %434 }
 0x383   :  { %vm416_vm7 = vcmp.eq.f32.partialorder %v413_v5, %v415_v15  ;;  %vm436_vm8 = vcmp.eq.f32.partialorder %v433_v4, %v435_v16  ;;  %v421_v26 = vcvt.f32.s32 %v415_v15  ;;  %v441_v29 = vcvt.f32.s32 %v435_v16 }
 0x384   :  { %v417_v19 = vsel %vm416_vm7, %v412_v17, inf  ;;  %v437_v20 = vsel %vm436_vm8, %v432_v18, inf }
 0x385   :  { %418 = vmin.xlane.f32.xlu1 %v417_v19  ;;  %438 = vmin.xlane.f32.xlu0 %v437_v20  ;;  %v422_v33 = vshll.u32 %v421_v26, 16  ;;  %v442_v37 = vshll.u32 %v441_v29, 16 }
 0x386   :  { %v455_v21 = vpop.xlane.xlu1 %454 }
 0x387   :  { %vm456_vm9 = vcmp.eq.f32.partialorder %v453_v7, %v455_v21  ;;  %v461_v34 = vcvt.f32.s32 %v455_v21 }
 0x388   :  { %v457_v23 = vsel %vm456_vm9, %v452_v22, inf }
 0x389   :  { %458 = vmin.xlane.f32.xlu1 %v457_v23  ;;  %v462_v42 = vshll.u32 %v461_v34, 16 }
 0x40a   :  { %v399_v25 = vpop.xlane.xlu0 %398 }
 0x40b   :  { %v400_v27 = vcvt.f32.s32 %v399_v25 }
 0x40d   :  { %v403_v30 = vadd.s32 %v402_v28, %v400_v27 }
 0x40e   :  { %v419_v31 = vpop.xlane.xlu1 %418  ;;  %v439_v32 = vpop.xlane.xlu0 %438 }
 0x40f   :  { %v420_v35 = vcvt.f32.s32 %v419_v31  ;;  %v440_v36 = vcvt.f32.s32 %v439_v32  ;;  %v405_v39 = vsel %vm404_vm10, %v403_v30, 0 }
 0x411   :  { %v423_v38 = vadd.s32 %v422_v33, %v420_v35  ;;  %v443_v40 = vadd.s32 %v442_v37, %v440_v36 }
 0x412   :  { %v459_v41 = vpop.xlane.xlu1 %458 }
 0x413   :  { %v425_v43 = vsel %vm424_vm11, %v423_v38, %v405_v39  ;;  %v460_v44 = vcvt.f32.s32 %v459_v41 }
 0x414   :  { %v445_v46 = vsel %vm444_vm12, %v443_v40, %v425_v43 }
 0x415   :  { %v463_v45 = vadd.s32 %v462_v42, %v460_v44 }
 0x417   :  { %v465_v47 = vsel %vm464_vm13, %v463_v45, %v445_v46 }
 0x418   :  { %466 = vst [vmem:[#allocation5] sm:$0xff] %v465_v47 }
 0x419   :  { %557 = shalt.err (!%p554_p9)
}
 0x41a   :  { %476 = dma.vmem_to_hbm [thread:$0]  %s474_s15, 128, %s658_s4, [#allocation4]  }
 0x41b   :  { %568 = dma.done.wait [#allocation4], 128  }
 0x41c   :  { %569 = vsyncadd [#allocation4], 4294967168 }
 0x41d   :  { %480 = vsyncpa [#allocation3], 1 }
 0x41e   :  { %481 = vsyncpa [#allocation4], 1 }

</bundles_post_ra>
